<compile_context>
chip_gen: v5e
topology: v5e:2x2
jax: 0.10.0
libtpu: 0.0.40
codegen_flags: <defaults>
</compile_context>

<pallas_src>
import jax
import jax.numpy as jnp
from jax.experimental import pallas as pl
from jax.experimental.pallas import tpu as pltpu


def fused_select_pool_mlp_kernel(nv_ref, nn_ref,                  # scalar prefetch (SMEM)
                                 v_ref, c_ref, f_ref,             # per-block inputs
                                 w1_ref, b1_ref, w2_ref, b2_ref,  # resident weights
                                 o_ref,                           # [1, GB, C] output block
                                 mask_ref):                       # [GB, N, 1] VMEM scratch
    GB, _, VT = v_ref.shape
    N = c_ref.shape[1]

    g = pl.program_id(0)
    vt = pl.program_id(1)
    base = g * GB

    @pl.when(vt == 0)
    def _():
        mask_ref[...] = jnp.zeros_like(mask_ref)

    verts_t = v_ref[...].astype(jnp.float32)   # [GB, 3, VT]  (VT lane-dense)
    coords = c_ref[...].astype(jnp.float32)    # [GB, N, 3]

    # True per-graph counts: SMEM scalars broadcast into [GB, 1, 1] vectors.
    g_iota = jax.lax.broadcasted_iota(jnp.int32, (GB, 1, 1), 0)
    nv_b = jnp.zeros((GB, 1, 1), jnp.int32)
    nn_b = jnp.zeros((GB, 1, 1), jnp.int32)
    for gb in range(GB):  # GB is small and static; unrolled scalar reads + selects
        nv_b = jnp.where(g_iota == gb, nv_ref[base + gb], nv_b)
        nn_b = jnp.where(g_iota == gb, nn_ref[base + gb], nn_b)

    n_iota = jax.lax.broadcasted_iota(jnp.int32, (1, N, VT), 1)             # node index
    v_iota = jax.lax.broadcasted_iota(jnp.int32, (1, 1, VT), 2) + vt * VT   # global vertex index

    # d2[g, n, v] = || coords[g, n] - verts[g, v] ||^2, direct VPU form (3 FMA passes,
    # no K=3 MXU matmul, no catastrophic-cancellation norm expansion).
    d2 = jnp.zeros((GB, N, VT), jnp.float32)
    for k in range(3):
        diff = coords[:, :, k:k + 1] - verts_t[:, k:k + 1, :]   # [GB,N,1] - [GB,1,VT]
        d2 = d2 + diff * diff

    # Padded C-alpha rows must never win the argmin.
    d2 = jnp.where(n_iota < nn_b, d2, jnp.inf)

    # First-index argmin over nodes (axis 1) per vertex (torch tie convention).
    # NOTE: `d2 <= mind` relies on mind coming from this exact d2 array (bitwise ties).
    mind = jnp.min(d2, axis=1, keepdims=True)                               # [GB,1,VT]
    amin = jnp.min(jnp.where(d2 <= mind, n_iota, N), axis=1, keepdims=True)  # [GB,1,VT]

    # mask[g, n] = 1 iff *valid* node n is the argmin of some *valid* vertex (== unique()).
    is_sel = (amin == n_iota) & (v_iota < nv_b) & (n_iota < nn_b)           # [GB,N,VT]
    tile_mask = jnp.max(is_sel.astype(jnp.float32), axis=2, keepdims=True)  # [GB,N,1]
    mask_ref[...] = jnp.maximum(mask_ref[...], tile_mask)

    # After the last V tile: pooled sum (VPU multiply + sublane reduce) + fused top_net.
    @pl.when(vt == pl.num_programs(1) - 1)
    def _():
        feats = f_ref[...].astype(jnp.float32)                              # [GB, N, H]
        pooled = jnp.sum(mask_ref[...] * feats, axis=1)                     # [GB, H]
        # top_net: Linear(H,H) -> ReLU -> Dropout(eval: identity) -> Linear(H,7).
        h = jnp.dot(pooled, w1_ref[...], preferred_element_type=jnp.float32) + b1_ref[...]
        h = jnp.maximum(h, 0.0)
        o_ref[0] = jnp.dot(h, w2_ref[...], preferred_element_type=jnp.float32) + b2_ref[...]


def pronet_masif_ligand_forward(verts, coords_ca, node_feats, n_verts, n_nodes, params,
                                graphs_per_step=None, v_tile=None, vmem_limit_bytes=None):
    """verts [B,V,3], coords_ca [B,N,3], node_feats [B,N,H] (ProNet embeddings, f32 or bf16),
    n_verts/n_nodes [B] int32 true counts of the padded per-graph arrays.
    params = (w1[H,H], b1[1,H], w2[H,C], b2[1,C]) stored as (in, out); torch Linear is (out, in)."""
    B, V, _ = verts.shape
    _, N, H = node_feats.shape
    w1, b1, w2, b2 = params
    C = w2.shape[1]

    # Graphs per grid step: default B//2 so v7x's two TensorCores each take one step;
    # on single-TC v5e/v6e it just halves the (tiny) per-step overhead count.
    GB = max(B // 2, 1) if graphs_per_step is None else min(graphs_per_step, B)
    assert B % GB == 0, "pad the batch so graphs_per_step divides it"
    NB = B // GB

    # V tiling for production MaSIF vertex counts; partial tiles must be 128-lane multiples.
    VT = V if v_tile is None else min(v_tile, V)
    assert V % VT == 0, "pad V so the V tile divides it"
    assert VT == V or VT % 128 == 0, "partial V tiles must be multiples of 128 lanes"
    NVT = V // VT

    # Lane-dense coordinate layout for the big per-vertex axis.
    verts_t = jnp.transpose(verts, (0, 2, 1))                               # [B, 3, V]
    # TODO(synk): for N in the hundreds, also repack coords_ca as [B, 3, N] to avoid the
    # 3->128 lane padding of its VMEM block; negligible at demo N.

    cp_kwargs = dict(dimension_semantics=("parallel", "arbitrary"))
    if vmem_limit_bytes is not None:   # raise above scoped default (esp. v5e's 16 MiB)
        cp_kwargs["vmem_limit_bytes"] = vmem_limit_bytes

    out = pl.pallas_call(
        fused_select_pool_mlp_kernel,
        out_shape=jax.ShapeDtypeStruct((NB, GB, C), jnp.float32),
        grid_spec=pltpu.PrefetchScalarGridSpec(
            num_scalar_prefetch=2,
            grid=(NB, NVT),
            in_specs=[
                pl.BlockSpec((GB, 3, VT), lambda g, vt, nv, nn: (g, 0, vt)),
                pl.BlockSpec((GB, N, 3), lambda g, vt, nv, nn: (g, 0, 0)),
                pl.BlockSpec((GB, N, H), lambda g, vt, nv, nn: (g, 0, 0)),
                # top_net weights: constant block index -> stay VMEM-resident.
                pl.BlockSpec((H, H), lambda g, vt, nv, nn: (0, 0)),
                pl.BlockSpec((1, H), lambda g, vt, nv, nn: (0, 0)),
                pl.BlockSpec((H, C), lambda g, vt, nv, nn: (0, 0)),
                pl.BlockSpec((1, C), lambda g, vt, nv, nn: (0, 0)),
            ],
            out_specs=pl.BlockSpec((1, GB, C), lambda g, vt, nv, nn: (g, 0, 0)),
            scratch_shapes=[pltpu.VMEM((GB, N, 1), jnp.float32)],
        ),
        compiler_params=pltpu.CompilerParams(**cp_kwargs),
    )(n_verts, n_nodes, verts_t, coords_ca, node_feats, w1, b1, w2, b2)

    return out.reshape(B, C)


def _reference_forward(verts, coords_ca, node_feats, n_verts, n_nodes, params):
    """Pure-JAX reference mirroring the PyTorch semantics (ragged via true counts)."""
    w1, b1, w2, b2 = params
    B, V, _ = verts.shape
    _, N, H = node_feats.shape
    pooled = []
    for g in range(B):
        nv = int(n_verts[g])
        nn_ = int(n_nodes[g])
        v = verts[g][:nv]                                                   # [nv, 3]
        c = coords_ca[g][:nn_]                                              # [nn, 3]
        d = jnp.sqrt(jnp.sum((v[:, None, :] - c[None, :, :]) ** 2, -1))
        idx = jnp.argmin(d, axis=1)                                         # [nv]
        mask = jnp.zeros((N,), jnp.float32).at[idx].set(1.0)                # unique() -> union
        pooled.append(mask @ node_feats[g].astype(jnp.float32))
    x = jnp.stack(pooled)
    h = jnp.maximum(x @ w1 + b1, 0.0)
    return h @ w2 + b2


if __name__ == "__main__":
    B, V, N, H, C = 8, 16, 12, 32, 7   # small shapes; hidden_channels=32, 7-way output

    key = jax.random.PRNGKey(0)
    k1, k2, k3, k4, k5, k6, k7 = jax.random.split(key, 7)

    verts = jax.random.normal(k1, (B, V, 3), jnp.float32) * 5.0
    coords_ca = jax.random.normal(k2, (B, N, 3), jnp.float32) * 5.0
    node_feats = jax.random.normal(k3, (B, N, H), jnp.float32)

    # True (unpadded) per-graph sizes; entries beyond these counts are padding.
    n_verts = jnp.array([16, 12, 16, 10, 16, 8, 16, 14], jnp.int32)
    n_nodes = jnp.array([12, 9, 12, 7, 12, 12, 10, 12], jnp.int32)

    # Deterministic synthetic top_net parameters (stored as (in, out); torch is (out, in)).
    w1 = jax.random.normal(k4, (H, H), jnp.float32) * 0.1
    b1 = jax.random.normal(k5, (1, H), jnp.float32) * 0.01
    w2 = jax.random.normal(k6, (H, C), jnp.float32) * 0.1
    b2 = jax.random.normal(k7, (1, C), jnp.float32) * 0.01
    params = (w1, b1, w2, b2)

    out = pronet_masif_ligand_forward(verts, coords_ca, node_feats,
                                      n_verts, n_nodes, params)   # GB=B//2 -> grid=(2, 1)
    out = jax.block_until_ready(out)
    assert out.shape == (B, C)

    ref = _reference_forward(verts, coords_ca, node_feats, n_verts, n_nodes, params)
    assert jnp.allclose(out, ref, atol=1e-3, rtol=1e-3), (out, ref)

    print("KERNEL_OK")
</pallas_src>

<mosaic_0001>
module attributes {stable_mosaic.version = 11 : i64} {
  func.func @fused_select_pool_mlp_kernel(%arg0: i32, %arg1: i32, %arg2: memref<8xi32, #tpu.memory_space<smem>>, %arg3: memref<8xi32, #tpu.memory_space<smem>>, %arg4: memref<4x3x16xf32, #tpu.memory_space<vmem>>, %arg5: memref<4x12x3xf32, #tpu.memory_space<vmem>>, %arg6: memref<4x12x32xf32, #tpu.memory_space<vmem>>, %arg7: memref<32x32xf32, #tpu.memory_space<vmem>>, %arg8: memref<1x32xf32, #tpu.memory_space<vmem>>, %arg9: memref<32x7xf32, #tpu.memory_space<vmem>>, %arg10: memref<1x7xf32, #tpu.memory_space<vmem>>, %arg11: memref<1x4x7xf32, #tpu.memory_space<vmem>>, %arg12: memref<4x12x1xf32, #tpu.memory_space<vmem>>) attributes {dimension_semantics = [#tpu.dimension_semantics<parallel>, #tpu.dimension_semantics<arbitrary>], iteration_bounds = array<i64: 2, 1>, scalar_prefetch = 2 : i64, scratch_operands = 1 : i64, tpu.core_type = #tpu.core_type<tc>, window_params = [{transform_indices = @transform_0, window_bounds = array<i64: 4, 3, 16>}, {transform_indices = @transform_1, window_bounds = array<i64: 4, 12, 3>}, {transform_indices = @transform_2, window_bounds = array<i64: 4, 12, 32>}, {pipeline_mode = #tpu.pipeline_mode<synchronous>, transform_indices = @transform_3, window_bounds = array<i64: 32, 32>}, {pipeline_mode = #tpu.pipeline_mode<synchronous>, transform_indices = @transform_4, window_bounds = array<i64: 1, 32>}, {pipeline_mode = #tpu.pipeline_mode<synchronous>, transform_indices = @transform_5, window_bounds = array<i64: 32, 7>}, {pipeline_mode = #tpu.pipeline_mode<synchronous>, transform_indices = @transform_6, window_bounds = array<i64: 1, 7>}, {transform_indices = @transform_7, window_bounds = array<i64: 1, 4, 7>}]} {
    %c4_i32 = arith.constant 4 : i32
    %0 = arith.muli %arg0, %c4_i32 : i32
    %c0_i32 = arith.constant 0 : i32
    %1 = arith.cmpi eq, %arg1, %c0_i32 : i32
    %2 = arith.extui %1 : i1 to i32
    %c0_i32_0 = arith.constant 0 : i32
    %3 = arith.cmpi ne, %2, %c0_i32_0 : i32
    scf.if %3 {
      %cst_33 = arith.constant 0.000000e+00 : f32
      %129 = vector.broadcast %cst_33 : f32 to vector<4x12x1xf32>
      %c0_34 = arith.constant 0 : index
      %c0_35 = arith.constant 0 : index
      %c0_36 = arith.constant 0 : index
      %130 = vector.load %arg12[%c0_34, %c0_35, %c0_36] : memref<4x12x1xf32, #tpu.memory_space<vmem>>, vector<4x12x1xf32>
      tpu.vector_store %arg12[%c0_34, %c0_35, %c0_36], %129 {strides = array<i32>} : memref<4x12x1xf32, #tpu.memory_space<vmem>>, vector<4x12x1xf32>,
    } else {
    }
    %c0 = arith.constant 0 : index
    %c0_1 = arith.constant 0 : index
    %c0_2 = arith.constant 0 : index
    %4 = vector.load %arg4[%c0, %c0_1, %c0_2] : memref<4x3x16xf32, #tpu.memory_space<vmem>>, vector<4x3x16xf32>
    %c0_3 = arith.constant 0 : index
    %c0_4 = arith.constant 0 : index
    %c0_5 = arith.constant 0 : index
    %5 = vector.load %arg5[%c0_3, %c0_4, %c0_5] : memref<4x12x3xf32, #tpu.memory_space<vmem>>, vector<4x12x3xf32>
    %6 = tpu.iota {dimensions = array<i32: 0>} : vector<4x1x1xi32>
    %c0_i32_6 = arith.constant 0 : i32
    %7 = vector.broadcast %c0_i32_6 : i32 to vector<4x1x1xi32>
    %c0_i32_7 = arith.constant 0 : i32
    %8 = vector.broadcast %c0_i32_7 : i32 to vector<4x1x1xi32>
    %c0_i32_8 = arith.constant 0 : i32
    %9 = vector.broadcast %c0_i32_8 : i32 to vector<4x1x1xi32>
    %10 = arith.cmpi eq, %6, %9 : vector<4x1x1xi32>
    %c0_i32_9 = arith.constant 0 : i32
    %11 = arith.addi %0, %c0_i32_9 : i32
    %12 = arith.index_cast %11 : i32 to index
    %13 = memref.load %arg2[%12] : memref<8xi32, #tpu.memory_space<smem>>
    %14 = vector.broadcast %13 : i32 to vector<4x1x1xi32>
    %15 = arith.select %10, %14, %7 : vector<4x1x1xi1>, vector<4x1x1xi32>
    %c0_i32_10 = arith.constant 0 : i32
    %16 = vector.broadcast %c0_i32_10 : i32 to vector<4x1x1xi32>
    %17 = arith.cmpi eq, %6, %16 : vector<4x1x1xi32>
    %c0_i32_11 = arith.constant 0 : i32
    %18 = arith.addi %0, %c0_i32_11 : i32
    %19 = arith.index_cast %18 : i32 to index
    %20 = memref.load %arg3[%19] : memref<8xi32, #tpu.memory_space<smem>>
    %21 = vector.broadcast %20 : i32 to vector<4x1x1xi32>
    %22 = arith.select %17, %21, %8 : vector<4x1x1xi1>, vector<4x1x1xi32>
    %c1_i32 = arith.constant 1 : i32
    %23 = vector.broadcast %c1_i32 : i32 to vector<4x1x1xi32>
    %24 = arith.cmpi eq, %6, %23 : vector<4x1x1xi32>
    %c1_i32_12 = arith.constant 1 : i32
    %25 = arith.addi %0, %c1_i32_12 : i32
    %26 = arith.index_cast %25 : i32 to index
    %27 = memref.load %arg2[%26] : memref<8xi32, #tpu.memory_space<smem>>
    %28 = vector.broadcast %27 : i32 to vector<4x1x1xi32>
    %29 = arith.select %24, %28, %15 : vector<4x1x1xi1>, vector<4x1x1xi32>
    %c1_i32_13 = arith.constant 1 : i32
    %30 = vector.broadcast %c1_i32_13 : i32 to vector<4x1x1xi32>
    %31 = arith.cmpi eq, %6, %30 : vector<4x1x1xi32>
    %c1_i32_14 = arith.constant 1 : i32
    %32 = arith.addi %0, %c1_i32_14 : i32
    %33 = arith.index_cast %32 : i32 to index
    %34 = memref.load %arg3[%33] : memref<8xi32, #tpu.memory_space<smem>>
    %35 = vector.broadcast %34 : i32 to vector<4x1x1xi32>
    %36 = arith.select %31, %35, %22 : vector<4x1x1xi1>, vector<4x1x1xi32>
    %c2_i32 = arith.constant 2 : i32
    %37 = vector.broadcast %c2_i32 : i32 to vector<4x1x1xi32>
    %38 = arith.cmpi eq, %6, %37 : vector<4x1x1xi32>
    %c2_i32_15 = arith.constant 2 : i32
    %39 = arith.addi %0, %c2_i32_15 : i32
    %40 = arith.index_cast %39 : i32 to index
    %41 = memref.load %arg2[%40] : memref<8xi32, #tpu.memory_space<smem>>
    %42 = vector.broadcast %41 : i32 to vector<4x1x1xi32>
    %43 = arith.select %38, %42, %29 : vector<4x1x1xi1>, vector<4x1x1xi32>
    %c2_i32_16 = arith.constant 2 : i32
    %44 = vector.broadcast %c2_i32_16 : i32 to vector<4x1x1xi32>
    %45 = arith.cmpi eq, %6, %44 : vector<4x1x1xi32>
    %c2_i32_17 = arith.constant 2 : i32
    %46 = arith.addi %0, %c2_i32_17 : i32
    %47 = arith.index_cast %46 : i32 to index
    %48 = memref.load %arg3[%47] : memref<8xi32, #tpu.memory_space<smem>>
    %49 = vector.broadcast %48 : i32 to vector<4x1x1xi32>
    %50 = arith.select %45, %49, %36 : vector<4x1x1xi1>, vector<4x1x1xi32>
    %c3_i32 = arith.constant 3 : i32
    %51 = vector.broadcast %c3_i32 : i32 to vector<4x1x1xi32>
    %52 = arith.cmpi eq, %6, %51 : vector<4x1x1xi32>
    %c3_i32_18 = arith.constant 3 : i32
    %53 = arith.addi %0, %c3_i32_18 : i32
    %54 = arith.index_cast %53 : i32 to index
    %55 = memref.load %arg2[%54] : memref<8xi32, #tpu.memory_space<smem>>
    %56 = vector.broadcast %55 : i32 to vector<4x1x1xi32>
    %57 = arith.select %52, %56, %43 : vector<4x1x1xi1>, vector<4x1x1xi32>
    %c3_i32_19 = arith.constant 3 : i32
    %58 = vector.broadcast %c3_i32_19 : i32 to vector<4x1x1xi32>
    %59 = arith.cmpi eq, %6, %58 : vector<4x1x1xi32>
    %c3_i32_20 = arith.constant 3 : i32
    %60 = arith.addi %0, %c3_i32_20 : i32
    %61 = arith.index_cast %60 : i32 to index
    %62 = memref.load %arg3[%61] : memref<8xi32, #tpu.memory_space<smem>>
    %63 = vector.broadcast %62 : i32 to vector<4x1x1xi32>
    %64 = arith.select %59, %63, %50 : vector<4x1x1xi1>, vector<4x1x1xi32>
    %65 = tpu.iota {dimensions = array<i32: 1>} : vector<1x12x16xi32>
    %66 = tpu.iota {dimensions = array<i32: 2>} : vector<1x1x16xi32>
    %c16_i32 = arith.constant 16 : i32
    %67 = arith.muli %arg1, %c16_i32 : i32
    %68 = vector.broadcast %67 : i32 to vector<1x1x16xi32>
    %69 = arith.addi %66, %68 : vector<1x1x16xi32>
    %cst = arith.constant 0.000000e+00 : f32
    %70 = vector.broadcast %cst : f32 to vector<4x12x16xf32>
    %71 = vector.extract_strided_slice %5 {offsets = [0, 0, 0], sizes = [4, 12, 1], strides = [1, 1, 1]} : vector<4x12x3xf32> to vector<4x12x1xf32>
    %72 = vector.extract_strided_slice %4 {offsets = [0, 0, 0], sizes = [4, 1, 16], strides = [1, 1, 1]} : vector<4x3x16xf32> to vector<4x1x16xf32>
    %73 = vector.broadcast %71 : vector<4x12x1xf32> to vector<4x12x16xf32>
    %74 = vector.broadcast %72 : vector<4x1x16xf32> to vector<4x12x16xf32>
    %75 = arith.subf %73, %74 : vector<4x12x16xf32>
    %76 = arith.mulf %75, %75 : vector<4x12x16xf32>
    %77 = arith.addf %70, %76 : vector<4x12x16xf32>
    %78 = vector.extract_strided_slice %5 {offsets = [0, 0, 1], sizes = [4, 12, 1], strides = [1, 1, 1]} : vector<4x12x3xf32> to vector<4x12x1xf32>
    %79 = vector.extract_strided_slice %4 {offsets = [0, 1, 0], sizes = [4, 1, 16], strides = [1, 1, 1]} : vector<4x3x16xf32> to vector<4x1x16xf32>
    %80 = vector.broadcast %78 : vector<4x12x1xf32> to vector<4x12x16xf32>
    %81 = vector.broadcast %79 : vector<4x1x16xf32> to vector<4x12x16xf32>
    %82 = arith.subf %80, %81 : vector<4x12x16xf32>
    %83 = arith.mulf %82, %82 : vector<4x12x16xf32>
    %84 = arith.addf %77, %83 : vector<4x12x16xf32>
    %85 = vector.extract_strided_slice %5 {offsets = [0, 0, 2], sizes = [4, 12, 1], strides = [1, 1, 1]} : vector<4x12x3xf32> to vector<4x12x1xf32>
    %86 = vector.extract_strided_slice %4 {offsets = [0, 2, 0], sizes = [4, 1, 16], strides = [1, 1, 1]} : vector<4x3x16xf32> to vector<4x1x16xf32>
    %87 = vector.broadcast %85 : vector<4x12x1xf32> to vector<4x12x16xf32>
    %88 = vector.broadcast %86 : vector<4x1x16xf32> to vector<4x12x16xf32>
    %89 = arith.subf %87, %88 : vector<4x12x16xf32>
    %90 = arith.mulf %89, %89 : vector<4x12x16xf32>
    %91 = arith.addf %84, %90 : vector<4x12x16xf32>
    %92 = vector.broadcast %65 : vector<1x12x16xi32> to vector<4x12x16xi32>
    %93 = vector.broadcast %64 : vector<4x1x1xi32> to vector<4x12x16xi32>
    %94 = arith.cmpi slt, %92, %93 : vector<4x12x16xi32>
    %cst_21 = arith.constant 0x7F800000 : f32
    %95 = vector.broadcast %cst_21 : f32 to vector<4x12x16xf32>
    %96 = arith.select %94, %91, %95 : vector<4x12x16xi1>, vector<4x12x16xf32>
    %cst_22 = arith.constant dense<0x7F800000> : vector<4x16xf32>
    %97 = vector.multi_reduction <minimumf>, %96, %cst_22 [1] : vector<4x12x16xf32> to vector<4x16xf32>
    %98 = vector.shape_cast %97 : vector<4x16xf32> to vector<4x1x16xf32>
    %99 = vector.broadcast %98 : vector<4x1x16xf32> to vector<4x12x16xf32>
    %100 = arith.cmpf ole, %96, %99 : vector<4x12x16xf32>
    %c12_i32 = arith.constant 12 : i32
    %101 = vector.shape_cast %65 : vector<1x12x16xi32> to vector<1x12x16xi32>
    %102 = vector.broadcast %101 : vector<1x12x16xi32> to vector<4x12x16xi32>
    %103 = vector.broadcast %c12_i32 : i32 to vector<4x12x16xi32>
    %104 = arith.select %100, %102, %103 : vector<4x12x16xi1>, vector<4x12x16xi32>
    %cst_23 = arith.constant dense<2147483647> : vector<4x16xi32>
    %105 = vector.multi_reduction <minsi>, %104, %cst_23 [1] : vector<4x12x16xi32> to vector<4x16xi32>
    %106 = vector.shape_cast %105 : vector<4x16xi32> to vector<4x1x16xi32>
    %107 = vector.broadcast %106 : vector<4x1x16xi32> to vector<4x12x16xi32>
    %108 = vector.broadcast %65 : vector<1x12x16xi32> to vector<4x12x16xi32>
    %109 = arith.cmpi eq, %107, %108 : vector<4x12x16xi32>
    %110 = vector.broadcast %69 : vector<1x1x16xi32> to vector<4x1x16xi32>
    %111 = vector.broadcast %57 : vector<4x1x1xi32> to vector<4x1x16xi32>
    %112 = arith.cmpi slt, %110, %111 : vector<4x1x16xi32>
    %113 = vector.broadcast %112 : vector<4x1x16xi1> to vector<4x12x16xi1>
    %114 = arith.andi %109, %113 : vector<4x12x16xi1>
    %115 = vector.broadcast %65 : vector<1x12x16xi32> to vector<4x12x16xi32>
    %116 = vector.broadcast %64 : vector<4x1x1xi32> to vector<4x12x16xi32>
    %117 = arith.cmpi slt, %115, %116 : vector<4x12x16xi32>
    %118 = arith.andi %114, %117 : vector<4x12x16xi1>
    %119 = arith.extui %118 : vector<4x12x16xi1> to vector<4x12x16xi32>
    %120 = arith.sitofp %119 : vector<4x12x16xi32> to vector<4x12x16xf32>
    %cst_24 = arith.constant dense<0xFF800000> : vector<4x12xf32>
    %121 = vector.multi_reduction <maximumf>, %120, %cst_24 [2] : vector<4x12x16xf32> to vector<4x12xf32>
    %122 = vector.shape_cast %121 : vector<4x12xf32> to vector<4x12x1xf32>
    %c0_25 = arith.constant 0 : index
    %c0_26 = arith.constant 0 : index
    %c0_27 = arith.constant 0 : index
    %123 = vector.load %arg12[%c0_25, %c0_26, %c0_27] : memref<4x12x1xf32, #tpu.memory_space<vmem>>, vector<4x12x1xf32>
    %124 = arith.maximumf %123, %122 : vector<4x12x1xf32>
    %c0_28 = arith.constant 0 : index
    %c0_29 = arith.constant 0 : index
    %c0_30 = arith.constant 0 : index
    %125 = vector.load %arg12[%c0_28, %c0_29, %c0_30] : memref<4x12x1xf32, #tpu.memory_space<vmem>>, vector<4x12x1xf32>
    tpu.vector_store %arg12[%c0_28, %c0_29, %c0_30], %124 {strides = array<i32>} : memref<4x12x1xf32, #tpu.memory_space<vmem>>, vector<4x12x1xf32>,
    %c0_i32_31 = arith.constant 0 : i32
    %126 = arith.cmpi eq, %arg1, %c0_i32_31 : i32
    %127 = arith.extui %126 : i1 to i32
    %c0_i32_32 = arith.constant 0 : i32
    %128 = arith.cmpi ne, %127, %c0_i32_32 : i32
    scf.if %128 {
      %c0_33 = arith.constant 0 : index
      %c0_34 = arith.constant 0 : index
      %c0_35 = arith.constant 0 : index
      %129 = vector.load %arg6[%c0_33, %c0_34, %c0_35] : memref<4x12x32xf32, #tpu.memory_space<vmem>>, vector<4x12x32xf32>
      %c0_36 = arith.constant 0 : index
      %c0_37 = arith.constant 0 : index
      %c0_38 = arith.constant 0 : index
      %130 = vector.load %arg12[%c0_36, %c0_37, %c0_38] : memref<4x12x1xf32, #tpu.memory_space<vmem>>, vector<4x12x1xf32>
      %131 = vector.broadcast %130 : vector<4x12x1xf32> to vector<4x12x32xf32>
      %132 = arith.mulf %131, %129 : vector<4x12x32xf32>
      %cst_39 = arith.constant dense<0.000000e+00> : vector<4x32xf32>
      %133 = vector.multi_reduction <add>, %132, %cst_39 [1] : vector<4x12x32xf32> to vector<4x32xf32>
      %c0_40 = arith.constant 0 : index
      %c0_41 = arith.constant 0 : index
      %134 = vector.load %arg7[%c0_40, %c0_41] : memref<32x32xf32, #tpu.memory_space<vmem>>, vector<32x32xf32>
      %cst_42 = arith.constant dense<0.000000e+00> : vector<4x32xf32>
      %135 = tpu.matmul %133, %134, %cst_42 {dimension_numbers = #tpu.dot_dimension_numbers<[1], [0], [0], [1], [0, 0, 1, 1], [], []>} : vector<4x32xf32>, vector<32x32xf32>, vector<4x32xf32> -> vector<4x32xf32>
      %c0_43 = arith.constant 0 : index
      %c0_44 = arith.constant 0 : index
      %136 = vector.load %arg8[%c0_43, %c0_44] : memref<1x32xf32, #tpu.memory_space<vmem>>, vector<1x32xf32>
      %137 = vector.broadcast %136 : vector<1x32xf32> to vector<4x32xf32>
      %138 = arith.addf %135, %137 : vector<4x32xf32>
      %cst_45 = arith.constant 0.000000e+00 : f32
      %139 = vector.broadcast %cst_45 : f32 to vector<4x32xf32>
      %140 = arith.maximumf %138, %139 : vector<4x32xf32>
      %c0_46 = arith.constant 0 : index
      %c0_47 = arith.constant 0 : index
      %141 = vector.load %arg9[%c0_46, %c0_47] : memref<32x7xf32, #tpu.memory_space<vmem>>, vector<32x7xf32>
      %cst_48 = arith.constant dense<0.000000e+00> : vector<4x7xf32>
      %142 = tpu.matmul %140, %141, %cst_48 {dimension_numbers = #tpu.dot_dimension_numbers<[1], [0], [0], [1], [0, 0, 1, 1], [], []>} : vector<4x32xf32>, vector<32x7xf32>, vector<4x7xf32> -> vector<4x7xf32>
      %c0_49 = arith.constant 0 : index
      %c0_50 = arith.constant 0 : index
      %143 = vector.load %arg10[%c0_49, %c0_50] : memref<1x7xf32, #tpu.memory_space<vmem>>, vector<1x7xf32>
      %144 = vector.broadcast %143 : vector<1x7xf32> to vector<4x7xf32>
      %145 = arith.addf %142, %144 : vector<4x7xf32>
      %c0_51 = arith.constant 0 : index
      %c0_52 = arith.constant 0 : index
      %c0_53 = arith.constant 0 : index
      %146 = vector.load %arg11[%c0_51, %c0_52, %c0_53] : memref<1x4x7xf32, #tpu.memory_space<vmem>>, vector<1x4x7xf32>
      %147 = vector.shape_cast %146 : vector<1x4x7xf32> to vector<4x7xf32>
      %148 = vector.shape_cast %145 : vector<4x7xf32> to vector<1x4x7xf32>
      tpu.vector_store %arg11[%c0_51, %c0_52, %c0_53], %148 {strides = array<i32>} : memref<1x4x7xf32, #tpu.memory_space<vmem>>, vector<1x4x7xf32>,
    } else {
    }
    return
  }
  func.func @transform_0(%arg0: i32, %arg1: i32, %arg2: memref<8xi32, #tpu.memory_space<smem>>, %arg3: memref<8xi32, #tpu.memory_space<smem>>) -> (i32, i32, i32) {
    %c0_i32 = arith.constant 0 : i32
    %c0_i32_0 = arith.constant 0 : i32
    return %arg0, %c0_i32, %arg1 : i32, i32, i32
  }
  func.func @transform_1(%arg0: i32, %arg1: i32, %arg2: memref<8xi32, #tpu.memory_space<smem>>, %arg3: memref<8xi32, #tpu.memory_space<smem>>) -> (i32, i32, i32) {
    %c0_i32 = arith.constant 0 : i32
    %c0_i32_0 = arith.constant 0 : i32
    %c0_i32_1 = arith.constant 0 : i32
    return %arg0, %c0_i32, %c0_i32_0 : i32, i32, i32
  }
  func.func @transform_2(%arg0: i32, %arg1: i32, %arg2: memref<8xi32, #tpu.memory_space<smem>>, %arg3: memref<8xi32, #tpu.memory_space<smem>>) -> (i32, i32, i32) {
    %c0_i32 = arith.constant 0 : i32
    %c0_i32_0 = arith.constant 0 : i32
    %c0_i32_1 = arith.constant 0 : i32
    return %arg0, %c0_i32, %c0_i32_0 : i32, i32, i32
  }
  func.func @transform_3(%arg0: i32, %arg1: i32, %arg2: memref<8xi32, #tpu.memory_space<smem>>, %arg3: memref<8xi32, #tpu.memory_space<smem>>) -> (i32, i32) {
    %c0_i32 = arith.constant 0 : i32
    %c0_i32_0 = arith.constant 0 : i32
    %c0_i32_1 = arith.constant 0 : i32
    return %c0_i32, %c0_i32_0 : i32, i32
  }
  func.func @transform_4(%arg0: i32, %arg1: i32, %arg2: memref<8xi32, #tpu.memory_space<smem>>, %arg3: memref<8xi32, #tpu.memory_space<smem>>) -> (i32, i32) {
    %c0_i32 = arith.constant 0 : i32
    %c0_i32_0 = arith.constant 0 : i32
    %c0_i32_1 = arith.constant 0 : i32
    return %c0_i32, %c0_i32_0 : i32, i32
  }
  func.func @transform_5(%arg0: i32, %arg1: i32, %arg2: memref<8xi32, #tpu.memory_space<smem>>, %arg3: memref<8xi32, #tpu.memory_space<smem>>) -> (i32, i32) {
    %c0_i32 = arith.constant 0 : i32
    %c0_i32_0 = arith.constant 0 : i32
    %c0_i32_1 = arith.constant 0 : i32
    return %c0_i32, %c0_i32_0 : i32, i32
  }
  func.func @transform_6(%arg0: i32, %arg1: i32, %arg2: memref<8xi32, #tpu.memory_space<smem>>, %arg3: memref<8xi32, #tpu.memory_space<smem>>) -> (i32, i32) {
    %c0_i32 = arith.constant 0 : i32
    %c0_i32_0 = arith.constant 0 : i32
    %c0_i32_1 = arith.constant 0 : i32
    return %c0_i32, %c0_i32_0 : i32, i32
  }
  func.func @transform_7(%arg0: i32, %arg1: i32, %arg2: memref<8xi32, #tpu.memory_space<smem>>, %arg3: memref<8xi32, #tpu.memory_space<smem>>) -> (i32, i32, i32) {
    %c0_i32 = arith.constant 0 : i32
    %c0_i32_0 = arith.constant 0 : i32
    %c0_i32_1 = arith.constant 0 : i32
    return %arg0, %c0_i32, %c0_i32_0 : i32, i32, i32
  }
}

</mosaic_0001>

<bundles_post_ra>
// kernel: tpu_custom_call.1
= control target key start
LH: loop header
LB: loop body
LE: loop exit
PB: predicated region body
PF: predicated region fallthrough
CT: control target
= control target key end

     0   :  { %s1338_s15 = smov [#allocation4]   ;;  %s1339_s16 = smov [#allocation5]   ;;  %s1838_s0 = inlined_call_operand.vmem [shape: s32[8], index: 0, kind: input, shape index: {}]   ;;  %s1839_s2 = inlined_call_operand.vmem [shape: f32[8,3,16], index: 2, kind: input, shape index: {}]   ;;  %s1840_s3 = inlined_call_operand.vmem [shape: f32[8,12,3], index: 3, kind: input, shape index: {}]   ;;  %s1841_s4 = inlined_call_operand.vmem [shape: f32[8,12,32], index: 4, kind: input, shape index: {}]   ;;  %s1842_s5 = inlined_call_operand.vmem [shape: f32[32,32], index: 5, kind: input, shape index: {}]   ;;  %s1843_s6 = inlined_call_operand.vmem [shape: f32[1,32], index: 6, kind: input, shape index: {}]   ;;  %s1844_s7 = inlined_call_operand.vmem [shape: f32[32,7], index: 7, kind: input, shape index: {}]   ;;  %s1845_s8 = inlined_call_operand.vmem [shape: f32[1,7], index: 8, kind: input, shape index: {}]   ;;  %s1846_s9 = inlined_call_operand.hbm [shape: f32[2,4,7], index: 9, kind: output, shape index: {}]   ;;  %s1847_s1 = inlined_call_operand.vmem [shape: s32[8], index: 1, kind: input, shape index: {}]  }
   0x1   :  { %s15_s11 = sshll.u32 %s1838_s0, 4  ;;  %s20_s14 = sshll.u32 %s1847_s1, 4  ;;  %s16_s11 = int_to_ptr.vmem [resolvable:$true] %s15_s11  ;;  %s21_s14 = int_to_ptr.vmem [resolvable:$true] %s20_s14 }
   0x2   :  { %18 = dma.vmem_to_smem %s16_s11, 16, %s1338_s15, [#allocation3] }
   0x3   :  { %23 = dma.vmem_to_smem %s21_s14, 16, %s1339_s16, [#allocation3] }
   0x4   :  { %1308 = dma.done.wait [#allocation3], 32 }
   0x5   :  { %1309 = vsyncadd [#allocation3], 4294967264 }
   0x6   :  { %26 = sfence }
   0x7   :  { %27 = vsyncpa [#allocation7], 0 }
   0x8   :  { %29 = vsyncpa [#allocation7 + $0x1], 0  ;;  %s1400_s17 = smov 0   ;;  %s1402_s18 = smov 0  }
   0x9   :  { %s1404_s0 = smov 0   ;;  %s1406_s19 = smov 0  }
   0xa   :  { %s1408_s1 = smov 0   ;;  %s1410_s20 = smov 0  }
   0xb LB: > { %s1122_s21 = sadd.s32 4294967295, %s1336_s20   ;;  %s1123_s22 = sadd.s32 4294967294, %s1336_s20   ;;  %s1336_s20 = sphi %s1410_s20, %s35_s20   ;;  %s1332_s1 = sphi %s1408_s1, %s1892_s1   ;;  %s1328_s19 = sphi %s1406_s19, %s1891_s19   ;;  %s1324_s0 = sphi %s1404_s0, %s1890_s0   ;;  %s1320_s18 = sphi %s1402_s18, %s1889_s18   ;;  %s1316_s17 = sphi %s1400_s17, %s1888_s17  }
   0xc   : > { %s47_s23 = sadd.s32 1, %s1332_s1  ;;  %s218_s24 = sadd.s32 1, %s1324_s0 }
   0xd   : > { %p49_p0 = scmp.ge.s32.totalorder %s47_s23, 2  ;;  %p228_p1 = scmp.ne.s32.totalorder %s1324_s0, %s1320_s18 }
   0xe   : > { %p229_p2 = scmp.eq.s32.totalorder %s1122_s21, 1  ;;  %p234_p3 = scmp.ne.s32.totalorder %s1320_s18, %s1316_s17 }
   0xf   : > { %s1894_s23 = smov (%p49_p0, %s47_s23), 0  ;;  %p235_p5 = scmp.eq.s32.totalorder %s1123_s22, 1 }
  0x10   : > { %p1438_p4 = por %p229_p2, %p228_p1  ;;  %s215_s26 = ssub.s32 %s1332_s1, %s1894_s23 }
  0x11   : > { %p1126_p6 = scmp.ge.s32.totalorder %s1336_s20, 1  ;;  %p216_p7 = scmp.eq.s32.totalorder %s215_s26, 0 }
  0x12   : > { %p1445_p8 = por %p235_p5, %p234_p3  ;;  %p297_p9 = scmp.lt.s32.totalorder %s1336_s20, 3 }
  0x13   : > { %s1451_s28 = scalar_select %p216_p7, %s1324_s0, %s218_s24  }
  0x14   : > { %p298_p10 = pnand %p1126_p6, %p297_p9 }
  0x15   : > { %s1453_s29 = sshll.u32 (!%p298_p10), %s1328_s19, 2 }
  0x16   : > { %301 = sbr.rel (%p298_p10) target bundleno = 785 (0x311), region = 48  ;;  %p345_p11 = scmp.lt.s32.totalorder (!%p298_p10), %s1453_s29, 7 }
  0x17   : > { %s1481_s21 = sld [smem:[#allocation5 + %s1453_s29]] (!%p298_p10)  ;;  %s398_s22 = sadd.s32 (!%p298_p10), 1, %s1453_s29 }
  0x18   : > { %s1495_s24 = sld [smem:[#allocation5 + %s398_s22]] (!%p298_p10)  ;;  %s403_s26 = sadd.s32 (!%p298_p10), 2, %s1453_s29 }
  0x19   : > { %s1531_s11 = sld [smem:[#allocation5 + %s403_s26]] (!%p298_p10)  ;;  %s408_s12 = sadd.s32 (!%p298_p10), 3, %s1453_s29 }
  0x1a   : > { %s1632_s15 = sld [smem:[#allocation4 + %s398_s22]] (!%p298_p10) }
  0x1b   : > { %v1340_v0 = vmov 1   ;;  %v1341_v1 = vmov 0   ;;  %s1457_s30 = scalar_select %p345_p11, %s1453_s29, 7  ;;  %v1342_v10 = vmov 2   ;;  %v413_v34 = vlaneseq }
  0x1c   : > { %1216 = vset.pattern.permute.xlu2 %v1340_v0  ;;  %1215 = vset.pattern.permute.xlu1 %v1341_v1  ;;  %vm1848_vm2 = vcmask 130048   ;;  %vm1849_vm3 = vcmask 125952   ;;  %s1670_s16 = sld [smem:[#allocation4 + %s403_s26]] }
  0x1d   : > { %1214 = vset.pattern.permute.xlu0 %v1341_v1  ;;  %s1151_s10 = sshll.u32 %s1457_s30, 4  ;;  %s1129_s14 = sshll.u32 %s1457_s30, 2  ;;  %v1487_v43 = vshrl.u32 %v413_v34, 7  ;;  %v397_v47 = vstv %s1481_s21 }
  0x1e   : > { %s358_s13 = scalar_lea.vmem %s1840_s3, %s1151_s10  ;;  %s1475_s19 = scalar_lea.vmem %s1839_s2, %s1129_s14 }
  0x1f   : > { %v388_v2 = vld [vmem:[%s358_s13 + $0x10] sm:$0xff]  ;;  %v386_v3 = vld [vmem:[%s358_s13] sm:$0xff]  ;;  %v389_v4 = vld [vmem:[%s358_s13 + $0x18] sm:$0xf]  ;;  %v1498_v55 = vadd.s32 8, %v1487_v43  ;;  %vm1501_vm0 = vcmp.lt.s32.totalorder %v1487_v43, %v397_v47  ;;  %s1591_s14 = sld [smem:[#allocation4 + %s1453_s29]] }
  0x20   : > { %433 = vperm.xlu1 %1215, %v388_v2   ;;  %490 = vperm.xlu2 %1216, %v386_v3   ;;  %v387_v5 = vld [vmem:[%s358_s13 + $0x8] sm:$0xf]  ;;  %v390_v6 = vld [vmem:[%s358_s13 + $0x20] sm:$0xff]  ;;  %v392_v8 = vld [vmem:[%s358_s13 + $0x30] sm:$0xff] }
  0x21   : > { %423 = vperm.xlu0 %1214, %v386_v3   ;;  %v391_v7 = vld [vmem:[%s358_s13 + $0x28] sm:$0xf]  ;;  %v393_v9 = vld [vmem:[%s358_s13 + $0x38] sm:$0xf]  ;;  %v382_v23 = vld [vmem:[%s1475_s19] sm:$0x7]  ;;  %vm1509_vm1 = vcmp.lt.s32.totalorder %v1498_v55, %v397_v47 }
  0x22   : > { %v521_v25 = vperm.slane %v382_v23, 1  ;;  %v461_v26 = vperm.slane %v382_v23, 0  ;;  %v581_v28 = vperm.slane %v382_v23, 2  ;;  %v383_v38 = vld [vmem:[%s1475_s19 + $0x4] sm:$0x7]  ;;  %v402_v23 = vstv %s1495_s24  ;;  %s1561_s13 = sld [smem:[#allocation5 + %s408_s12]]  ;;  %s1751_s24 = scalar_lea.vmem %s1841_s4, %s1151_s10 }
  0x23   : > { %v522_v40 = vperm.slane %v383_v38, 1  ;;  %v582_v46 = vperm.slane %v383_v38, 2  ;;  %v462_v48 = vperm.slane %v383_v38, 0  ;;  %v1506_v57 = vld [vmem:[%s1475_s19 + $0x8] sm:$0x7]  ;;  %vm1541_vm4 = vcmp.lt.s32.totalorder %v1498_v55, %v402_v23 }
  0x24   : > { %vm1548_vm5 = vcmp.lt.s32.totalorder %v1487_v43, %v402_v23 }
  0x28   : > { %438 = vperm.xlu1 %1215, %v389_v4   ;;  %494 = vperm.xlu2 %1216, %v387_v5   ;;  %v412_v23 = vstv %s1561_s13  ;;  %s341_s13 = sand.u32 1, %s1320_s18  }
  0x29   : > { %428 = vperm.xlu0 %1214, %v387_v5   ;;  %vm1607_vm11 = vcmp.lt.s32.totalorder %v1487_v43, %v412_v23  ;;  %vm1612_vm13 = vcmp.lt.s32.totalorder %v1498_v55, %v412_v23  ;;  %s1013_s30 = scalar_lea.sflag [#allocation7], %s341_s13 }
  0x30   : > { %1218 = vset.pattern.permute.xlu1 %v1340_v0  ;;  %1219 = vset.pattern.permute.xlu2 %v1341_v1 }
  0x31   : > { %1217 = vset.pattern.permute.xlu0 %v1340_v0  ;;  %502 = vperm.xlu1 %1218, %v389_v4  }
  0x32   : > { %443 = vperm.xlu2 %1219, %v390_v6   ;;  %498 = vperm.xlu0 %1217, %v388_v2  }
  0x39   : > { %1220 = vset.pattern.permute.xlu1 %v1341_v1 }
  0x3a   : > { %1221 = vset.pattern.permute.xlu2 %v1340_v0  ;;  %510 = vperm.xlu0 %1217, %v391_v7  }
  0x3b   : > { %448 = vperm.xlu1 %1220, %v391_v7   ;;  %506 = vperm.xlu2 %1221, %v390_v6  }
  0x42   : > { %514 = vperm.xlu0 %1217, %v392_v8  }
  0x43   : > { %453 = vperm.xlu1 %1220, %v392_v8   ;;  %1222 = vset.pattern.permute.xlu2 %v1341_v1 }
  0x44   : > { %458 = vperm.xlu2 %1222, %v393_v9  }
  0x4a   : > { %1225 = vset.pattern.permute.xlu0 %v1342_v10 }
  0x4b   : > { %1223 = vset.pattern.permute.xlu1 %v1340_v0  ;;  %554 = vperm.xlu0 %1225, %v387_v5   ;;  %v523_v5 = vperm.slane %v1506_v57, 1 }
  0x4c   : > { %518 = vperm.xlu1 %1223, %v393_v9   ;;  %1224 = vset.pattern.permute.xlu2 %v1342_v10 }
  0x4d   : > { %550 = vperm.xlu2 %1224, %v386_v3   ;;  %v463_v3 = vperm.slane %v1506_v57, 0 }
  0x53   : > { %574 = vperm.xlu0 %1225, %v392_v8  }
  0x54   : > { %1226 = vset.pattern.permute.xlu1 %v1342_v10 }
  0x55   : > { %558 = vperm.xlu1 %1226, %v388_v2   ;;  %562 = vperm.xlu2 %1224, %v389_v4  }
  0x5b   : > { %1227 = vset.pattern.permute.xlu0 %v1341_v1 }
  0x5d   : > { %566 = vperm.xlu1 %1226, %v390_v6   ;;  %570 = vperm.xlu2 %1224, %v391_v7   ;;  %v583_v6 = vperm.slane %v1506_v57, 2 }
  0x65   : > { %578 = vperm.xlu1 %1226, %v393_v9   ;;  %1229 = vset.pattern.permute.xlu2 %v1341_v1 }
  0x6d   : > { %1228 = vset.pattern.permute.xlu1 %v1341_v1 }
  0x7a   : > { %v491_v11 = vpop.permute.xlu2 %490 }
  0x7b   : > { %v525_v29 = vsub.f32 %v491_v11, %v521_v25 }
  0x7d   : > { %v533_v35 = vmul.f32 %v525_v29, %v525_v29 }
  0x82   : > { %v495_v12 = vpop.permute.xlu2 %494 }
  0x83   : > { %v526_v39 = vsub.f32 %v495_v12, %v521_v25 }
  0x85   : > { %v534_v50 = vmul.f32 %v526_v39, %v526_v39 }
  0x8c   : > { %v1465_v13 = vpop.permute.xlu2 %443 }
  0x8d   : > { %v469_v25 = vsub.f32 %v1465_v13, %v463_v3 }
  0x92   : > { %v434_v14 = vpop.permute.xlu1 %433 }
  0x93   : > { %v424_v15 = vpop.permute.xlu0 %423  ;;  %v467_v4 = vsub.f32 %v434_v14, %v462_v48 }
  0x94   : > { %v465_v30 = vsub.f32 %v424_v15, %v461_v26 }
  0x95   : > { %v1467_v18 = vpop.permute.xlu2 %506 }
  0x96   : > { %v473_v36 = vmul.f32 %v465_v30, %v465_v30 }
  0x98   : > { %v541_v44 = vadd.f32 %v533_v35, %v473_v36 }
  0x9a   : > { %v439_v16 = vpop.permute.xlu1 %438 }
  0x9b   : > { %v429_v17 = vpop.permute.xlu0 %428  ;;  %v468_v58 = vsub.f32 %v439_v16, %v462_v48  ;;  %v1534_v16 = vld [vmem:[%s1475_s19 + $0xc] sm:$0x7]  ;;  %s409_s19 = sld [smem:[#allocation4 + %s408_s12]] }
  0x9c   : > { %v466_v37 = vsub.f32 %v429_v17, %v461_v26  ;;  %v524_v38 = vperm.slane %v1534_v16, 1 }
  0x9d   : > { %v476_v7 = vmul.f32 %v468_v58, %v468_v58 }
  0x9e   : > { %v1469_v21 = vpop.permute.xlu2 %458  ;;  %v474_v45 = vmul.f32 %v466_v37, %v466_v37 }
  0xa0   : > { %v542_v59 = vadd.f32 %v534_v50, %v474_v45  ;;  %v584_v50 = vperm.slane %v1534_v16, 2 }
  0xa3   : > { %v503_v19 = vpop.permute.xlu1 %502 }
  0xa4   : > { %v499_v20 = vpop.permute.xlu0 %498  ;;  %v528_v51 = vsub.f32 %v503_v19, %v522_v40 }
  0xa5   : > { %v527_v0 = vsub.f32 %v499_v20, %v522_v40 }
  0xa6   : > { %v536_v63 = vmul.f32 %v528_v51, %v528_v51  ;;  %v407_v51 = vstv %s1531_s11 }
  0xa7   : > { %v551_v27 = vpop.permute.xlu2 %550  ;;  %v535_v19 = vmul.f32 %v527_v0, %v527_v0  ;;  %vm1574_vm6 = vcmp.lt.s32.totalorder %v1498_v55, %v407_v51  ;;  %vm1580_vm7 = vcmp.lt.s32.totalorder %v1487_v43, %v407_v51 }
  0xa8   : > { %v585_v33 = vsub.f32 %v551_v27, %v581_v28  ;;  %v544_v17 = vadd.f32 %v536_v63, %v476_v7  ;;  %v529_v27 = vsub.f32 %v1467_v18, %v523_v5  ;;  %v477_v18 = vmul.f32 %v469_v25, %v469_v25 }
  0xaa   : > { %v593_v41 = vmul.f32 %v585_v33, %v585_v33  ;;  %v464_v33 = vperm.slane %v1534_v16, 0 }
  0xac   : > { %v511_v22 = vpop.permute.xlu0 %510  ;;  %v601_v52 = vadd.f32 %v593_v41, %v541_v44  ;;  %v537_v44 = vmul.f32 %v529_v27, %v529_v27  ;;  %v472_v48 = vsub.f32 %v1469_v21, %v464_v33 }
  0xad   : > { %v449_v24 = vpop.permute.xlu1 %448  ;;  %v530_v11 = vsub.f32 %v511_v22, %v523_v5  ;;  %v475_v22 = vmul.f32 %v467_v4, %v467_v4 }
  0xae   : > { %v1515_v2 = vsel %vm1501_vm0, %v601_v52, inf  ;;  %v470_v12 = vsub.f32 %v449_v24, %v463_v3  ;;  %v545_v4 = vadd.f32 %v537_v44, %v477_v18  ;;  %v480_v5 = vmul.f32 %v472_v48, %v472_v48 }
  0xaf   : > { %v563_v42 = vpop.permute.xlu2 %562  ;;  %v626_v15 = vsel %vm1848_vm2, %v1515_v2, inf  ;;  %v538_v35 = vmul.f32 %v530_v11, %v530_v11  ;;  %v543_v13 = vadd.f32 %v535_v19, %v475_v22 }
  0xb0   : > { %v588_v60 = vsub.f32 %v563_v42, %v582_v46  ;;  %v478_v36 = vmul.f32 %v470_v12, %v470_v12  ;;  %v405_v42 = vstv %s1670_s16 }
  0xb2   : > { %v596_v8 = vmul.f32 %v588_v60, %v588_v60 }
  0xb4   : > { %v1478_v31 = vpop.permute.xlu0 %514 }
  0xb5   : > { %v1483_v32 = vpop.permute.xlu1 %453  ;;  %v531_v52 = vsub.f32 %v1478_v31, %v524_v38 }
  0xb7   : > { %v571_v9 = vpop.permute.xlu2 %570  ;;  %v539_v12 = vmul.f32 %v531_v52, %v531_v52 }
  0xb8   : > { %v590_v24 = vsub.f32 %v571_v9, %v583_v6 }
  0xba   : > { %v598_v41 = vmul.f32 %v590_v24, %v590_v24 }
  0xbd   : > { %v555_v49 = vpop.permute.xlu0 %554 }
  0xbe   : > { %v586_v53 = vsub.f32 %v555_v49, %v581_v28  ;;  %v1491_v54 = vpop.permute.xlu1 %518  ;;  %v604_v28 = vadd.f32 %v596_v8, %v544_v17  ;;  %v546_v49 = vadd.f32 %v538_v35, %v478_v36 }
  0xbf   : > { %v532_v7 = vsub.f32 %v1491_v54, %v524_v38 }
  0xc0   : > { %v594_v61 = vmul.f32 %v586_v53, %v586_v53  ;;  %v1554_v47 = vsel %vm1541_vm4, %v604_v28, inf  ;;  %v606_v60 = vadd.f32 %v598_v41, %v546_v49  ;;  %v1866_v41 = vmov 0 }
  0xc1   : > { %v637_v63 = vsel %vm1849_vm3, %v1554_v47, inf  ;;  %v540_v25 = vmul.f32 %v532_v7, %v532_v7  ;;  %v1867_v41 = vsel %vm1607_vm11, 4294967295, %v1866_v41 }
  0xc2   : > { %v602_v1 = vadd.f32 %v594_v61, %v542_v59  ;;  %v471_v59 = vsub.f32 %v1483_v32, %v464_v33 }
  0xc4   : > { %v1523_v10 = vsel %vm1509_vm1, %v602_v1, inf }
  0xc5   : > { %v628_v14 = vsel %vm1849_vm3, %v1523_v10, inf  ;;  %v575_v53 = vpop.permute.xlu0 %574 }
  0xc6   : > { %v629_v20 = vmin.f32 %v626_v15, %v628_v14  ;;  %v591_v32 = vsub.f32 %v575_v53, %v584_v50  ;;  %v479_v15 = vmul.f32 %v471_v59, %v471_v59  ;;  %v1586_v14 = vsel %vm1574_vm6, %v606_v60, inf }
  0xc7   : > { %v559_v26 = vpop.permute.xlu1 %558 }
  0xc8   : > { %v587_v29 = vsub.f32 %v559_v26, %v582_v46  ;;  %v630_v30 = vrot.slane %v629_v20, 4  ;;  %v599_v17 = vmul.f32 %v591_v32, %v591_v32  ;;  %v547_v27 = vadd.f32 %v539_v12, %v479_v15 }
  0xca   : > { %v595_v39 = vmul.f32 %v587_v29, %v587_v29  ;;  %v631_v40 = vmin.f32 %v629_v20, %v630_v30  ;;  %v607_v36 = vadd.f32 %v599_v17, %v547_v27 }
  0xcc   : > { %v603_v45 = vadd.f32 %v595_v39, %v543_v13  ;;  %v632_v46 = vrot.slane %v631_v40, 2  ;;  %v548_v39 = vadd.f32 %v540_v25, %v480_v5  ;;  %v1619_v53 = vsel %vm1607_vm11, %v607_v36, inf }
  0xce   : > { %v633_v57 = vmin.f32 %v631_v40, %v632_v46  ;;  %v1566_v58 = vsel %vm1548_vm5, %v603_v45, inf  ;;  %v1868_v45 = vmov 0 }
  0xcf   : > { %v567_v61 = vpop.permute.xlu1 %566  ;;  %v636_v21 = vsel %vm1848_vm2, %v1566_v58, inf  ;;  %v1869_v45 = vsel %vm1612_vm13, 4294967295, %v1868_v45 }
  0xd0   : > { %v589_v0 = vsub.f32 %v567_v61, %v583_v6  ;;  %v634_v1 = vrot.slane %v633_v57, 1  ;;  %v638_v3 = vmin.f32 %v636_v21, %v637_v63 }
  0xd2   : > { %v597_v8 = vmul.f32 %v589_v0, %v589_v0  ;;  %v635_v9 = vmin.f32 %v633_v57, %v634_v1  ;;  %v639_v11 = vrot.slane %v638_v3, 4  ;;  %v1622_v57 = vand.u32 127, %v413_v34 }
  0xd4   : > { %v605_v16 = vadd.f32 %v597_v8, %v545_v4  ;;  %vm663_vm8 = vcmp.le.f32.partialorder %v1515_v2, %v635_v9  ;;  %vm664_vm9 = vcmp.le.f32.partialorder %v1523_v10, %v635_v9  ;;  %v640_v54 = vmin.f32 %v638_v3, %v639_v11 }
  0xd5   : > { %v671_v19 = vsel %vm663_vm8, %v1487_v43, 12  ;;  %v672_v20 = vsel %vm664_vm9, %v1498_v55, 12  ;;  %v646_v10 = vsel %vm1849_vm3, %v1586_v14, inf }
  0xd6   : > { %v679_v22 = vsel %vm1848_vm2, %v671_v19, 2147483647  ;;  %v680_v24 = vsel %vm1849_vm3, %v672_v20, 2147483647  ;;  %v641_v26 = vrot.slane %v640_v54, 2  ;;  %v1600_v2 = vsel %vm1580_vm7, %v605_v16, inf }
  0xd7   : > { %v579_v28 = vpop.permute.xlu1 %578  ;;  %vm681_vm10 = vcmp.lt.s32.totalorder %v679_v22, %v680_v24  ;;  %v645_v35 = vsel %vm1848_vm2, %v1600_v2, inf  ;;  %v1343_v19 = vmov 0.0  }
  0xd8   : > { %v592_v29 = vsub.f32 %v579_v28, %v584_v50  ;;  %v682_v30 = vsel %vm681_vm10, %v679_v22, %v680_v24  ;;  %v642_v33 = vmin.f32 %v640_v54, %v641_v26  ;;  %v647_v38 = vmin.f32 %v645_v35, %v646_v10 }
  0xd9   : > { %v683_v13 = vrot.slane %v682_v30, 4  ;;  %v395_v50 = vstv %s1591_s14  ;;  %v400_v54 = vstv %s1632_s15  ;;  %s1127_s14 = sshll.u32 %s341_s13, 2 }
  0xda   : > { %v600_v40 = vmul.f32 %v592_v29, %v592_v29  ;;  %v643_v18 = vrot.slane %v642_v33, 1  ;;  %v648_v44 = vrot.slane %v647_v38, 4 }
  0xdb   : > { %vm684_vm12 = vcmp.lt.s32.totalorder %v682_v30, %v683_v13 }
  0xdc   : > { %v608_v46 = vadd.f32 %v600_v40, %v548_v39  ;;  %v685_v48 = vsel %vm684_vm12, %v682_v30, %v683_v13  ;;  %v644_v49 = vmin.f32 %v642_v33, %v643_v18  ;;  %v649_v52 = vmin.f32 %v647_v38, %v648_v44 }
  0xdd   : > { %v686_v51 = vrot.slane %v685_v48, 2  ;;  %vm1643_vm12 = vcmp.lt.s32.totalorder %v1622_v57, %v395_v50 }
  0xde   : > { %vm665_vm14 = vcmp.le.f32.partialorder %v1566_v58, %v644_v49  ;;  %vm666_vm15 = vcmp.le.f32.partialorder %v1554_v47, %v644_v49  ;;  %v1628_v59 = vsel %vm1612_vm13, %v608_v46, inf  ;;  %v650_v21 = vrot.slane %v649_v52, 2 }
  0xdf   : > { %vm687_vm8 = vcmp.lt.s32.totalorder %v685_v48, %v686_v51  ;;  %v673_v60 = vsel %vm665_vm14, %v1487_v43, 12  ;;  %v674_v61 = vsel %vm666_vm15, %v1498_v55, 12  ;;  %v654_v47 = vsel %vm1848_vm2, %v1619_v53, inf }
  0xe0   : > { %v688_v63 = vsel %vm687_vm8, %v685_v48, %v686_v51  ;;  %v692_v34 = vsel %vm1848_vm2, %v673_v60, 2147483647  ;;  %v693_v58 = vsel %vm1849_vm3, %v674_v61, 2147483647  ;;  %v651_v1 = vmin.f32 %v649_v52, %v650_v21 }
  0xe1   : > { %v689_v0 = vrot.slane %v688_v63, 1  ;;  %vm694_vm9 = vcmp.lt.s32.totalorder %v692_v34, %v693_v58  ;;  %v655_v3 = vsel %vm1849_vm3, %v1628_v59, inf }
  0xe2   : > { %v695_v4 = vsel %vm694_vm9, %v692_v34, %v693_v58  ;;  %v656_v5 = vmin.f32 %v654_v47, %v655_v3  ;;  %v652_v8 = vrot.slane %v651_v1, 1  ;;  %v410_v34 = vstv %s409_s19  ;;  %s1023_s19 = scalar_lea.hbm %s1846_s9, %s1453_s29 }
  0xe3   : > { %vm690_vm10 = vcmp.lt.s32.totalorder %v688_v63, %v689_v0  ;;  %v696_v7 = vrot.slane %v695_v4, 4  ;;  %s1027_s11 = sshll.u32 %s1023_s19, 4  ;;  %s1028_s11 = int_to_ptr.hbm [resolvable:$true] %s1027_s11 }
  0xe4   : > { %v691_v9 = vsel %vm690_vm10, %v688_v63, %v689_v0  ;;  %v657_v11 = vrot.slane %v656_v5, 4  ;;  %v653_v12 = vmin.f32 %v651_v1, %v652_v8  ;;  %s1270_s12 = sshra.s32 %s1028_s11, 4  ;;  %s1271_s12 = int_to_ptr.hbm [resolvable:$true] %s1270_s12 }
  0xe5   : > { %vm732_vm14 = vcmp.eq.s32.totalorder %v691_v9, %v1498_v55  ;;  %vm731_vm15 = vcmp.eq.s32.totalorder %v691_v9, %v1487_v43  ;;  %vm697_vm8 = vcmp.lt.s32.totalorder %v695_v4, %v696_v7  ;;  %s1272_s10 = scalar_lea.hbm %s1271_s12, 4  ;;  %p1277_p1 = scmp.lt.s32.totalorder %s1271_s12, %s1846_s9 }
  0xe6   : > { %vm752_vm9 = vmand %vm732_vm14, %vm1643_vm12  ;;  %v698_v15 = vsel %vm697_vm8, %v695_v4, %v696_v7  ;;  %v658_v16 = vmin.f32 %v656_v5, %v657_v11  ;;  %vm667_vm3 = vcmp.le.f32.partialorder %v1600_v2, %v653_v12  ;;  %vm668_vm10 = vcmp.le.f32.partialorder %v1586_v14, %v653_v12  ;;  %p1273_p12 = scmp.ne.s32.totalorder %s1271_s12, %s1272_s10 }
  0xe7   : > { %vm760_vm2 = vmand %vm752_vm9, %vm1509_vm1  ;;  %v699_v17 = vrot.slane %v698_v15, 2  ;;  %v675_v23 = vsel %vm667_vm3, %v1487_v43, 12  ;;  %v676_v25 = vsel %vm668_vm10, %v1498_v55, 12  ;;  %vm1872_vm14 = vcmask 125952  }
  0xe8   : > { %v1138_v20 = vsel %vm760_vm2, 1.0, %v1343_v19  ;;  %vm751_vm13 = vmand %vm731_vm15, %vm1643_vm12  ;;  %v659_v22 = vrot.slane %v658_v16, 2  ;;  %vm1873_vm9 = vcmask 130048   ;;  %vm374_vm12 = vcmask 3072   ;;  %p1274_p13 = pnand %p1273_p12, %p1438_p4 }
  0xe9   : > { %v786_v62 = vsel %vm1872_vm14, %v1138_v20, -inf  ;;  %vm759_vm1 = vmand %vm751_vm13, %vm1501_vm0  ;;  %vm700_vm8 = vcmp.lt.s32.totalorder %v698_v15, %v699_v17  ;;  %v705_v14 = vsel %vm1873_vm9, %v675_v23, 2147483647  ;;  %375 = vst.msk [vmem:[#allocation2 + $0x8] sm:$0xf] %vm374_vm12, %v1343_v19 }
  0xea   : > { %vm1874_vm11 = vmmov %vm1872_vm14  ;;  %787 = vmax.xlane.f32.xlu0 %v786_v62  ;;  %v1137_v26 = vsel %vm759_vm1, 1.0, %v1343_v19  ;;  %v701_v27 = vsel %vm700_vm8, %v698_v15, %v699_v17  ;;  %v660_v28 = vmin.f32 %v658_v16, %v659_v22  ;;  %377 = vst.msk [vmem:[#allocation2 + $0x18] sm:$0xf] %vm374_vm12, %v1343_v19  ;;  %p1275_p0 = pneg %p1274_p13 }
  0xeb   : > { %v706_v24 = vsel %vm1874_vm11, %v676_v25, 2147483647  ;;  %vm1875_vm3 = vmmov %vm1873_vm9  ;;  %v702_v10 = vrot.slane %v701_v27, 1  ;;  %vm1675_vm11 = vcmp.lt.s32.totalorder %v1622_v57, %v400_v54  ;;  %379 = vst.msk [vmem:[#allocation2 + $0x28] sm:$0xf] %vm374_vm12, %v1343_v19 }
  0xec   : > { %vm707_vm2 = vcmp.lt.s32.totalorder %v705_v14, %v706_v24  ;;  %v783_v2 = vsel %vm1875_vm3, %v1137_v26, -inf  ;;  %v661_v30 = vrot.slane %v660_v28, 1  ;;  %381 = vst.msk [vmem:[#allocation2 + $0x38] sm:$0xf] %vm374_vm12, %v1343_v19 }
  0xed   : > { %v708_v29 = vsel %vm707_vm2, %v705_v14, %v706_v24  ;;  %784 = vmax.xlane.f32.xlu2 %v783_v2  ;;  %vm703_vm0 = vcmp.lt.s32.totalorder %v701_v27, %v702_v10 }
  0xee   : > { %v709_v56 = vrot.slane %v708_v29, 4  ;;  %v704_v35 = vsel %vm703_vm0, %v701_v27, %v702_v10  ;;  %v662_v36 = vmin.f32 %v660_v28, %v661_v30  ;;  %vm1878_vm0 = vcmask 130048  }
  0xef   : > { %vm733_vm15 = vcmp.eq.s32.totalorder %v704_v35, %v1487_v43  ;;  %vm734_vm10 = vcmp.eq.s32.totalorder %v704_v35, %v1498_v55 }
  0xf0   : > { %vm710_vm13 = vcmp.lt.s32.totalorder %v708_v29, %v709_v56  ;;  %vm753_vm14 = vmand %vm733_vm15, %vm1675_vm11  ;;  %vm669_vm1 = vcmp.le.f32.partialorder %v1619_v53, %v662_v36  ;;  %vm670_vm8 = vcmp.le.f32.partialorder %v1628_v59, %v662_v36 }
  0xf1   : > { %v711_v13 = vsel %vm710_vm13, %v708_v29, %v709_v56  ;;  %vm761_vm9 = vmand %vm753_vm14, %vm1548_vm5  ;;  %v677_v39 = vsel %vm669_vm1, %v1487_v43, 12  ;;  %v678_v40 = vsel %vm670_vm8, %v1498_v55, 12  ;;  %vm1879_vm13 = vcmask 125952   ;;  %v810_v9 = vld [vmem:[#allocation2 + $0x18] sm:$0xf] }
  0xf2   : > { %v712_v38 = vrot.slane %v711_v13, 2  ;;  %v1139_v18 = vsel %vm761_vm9, 1.0, %v1343_v19  ;;  %vm754_vm2 = vmand %vm734_vm10, %vm1675_vm11  ;;  %v718_v44 = vsel %vm1878_vm0, %v677_v39, 2147483647  ;;  %v719_v46 = vsel %vm1879_vm13, %v678_v40, 2147483647 }
  0xf3   : > { %vm1880_vm15 = vmmov %vm1878_vm0  ;;  %vm720_vm14 = vcmp.lt.s32.totalorder %v718_v44, %v719_v46  ;;  %vm741_vm1 = vcmp.lt.s32.totalorder %v1622_v57, %v405_v42  ;;  %v812_v17 = vld [vmem:[#allocation2 + $0x28] sm:$0xf]  ;;  %v814_v27 = vld [vmem:[#allocation2 + $0x38] sm:$0xf] }
  0xf4   : > { %vm713_vm3 = vcmp.lt.s32.totalorder %v711_v13, %v712_v38  ;;  %v789_v48 = vsel %vm1880_vm15, %v1139_v18, -inf  ;;  %vm762_vm5 = vmand %vm754_vm2, %vm1541_vm4  ;;  %v721_v52 = vsel %vm720_vm14, %v718_v44, %v719_v46  ;;  %vm1883_vm14 = vcmask 130048   ;;  %v941_v39 = vld [vmem:[%s1842_s5 + $0x18] sm:$0xff]  ;;  %v836_v40 = vld [vmem:[%s1751_s24] sm:$0xff] }
  0xf5   : > { %v714_v49 = vsel %vm713_vm3, %v711_v13, %v712_v38  ;;  %790 = vmax.xlane.f32.xlu1 %v789_v48  ;;  %v1140_v50 = vsel %vm762_vm5, 1.0, %v1343_v19  ;;  %vm1881_vm11 = vmmov %vm1879_vm13  ;;  %v722_v59 = vrot.slane %v721_v52, 4  ;;  %v838_v13 = vld [vmem:[%s1751_s24 + $0x10] sm:$0xff]  ;;  %v837_v38 = vld [vmem:[%s1751_s24 + $0x8] sm:$0xf]  ;;  %970 = vmatpush.msra.mxu0 %v941_v39 }
  0xf6   : > { %v715_v51 = vrot.slane %v714_v49, 1  ;;  %v792_v53 = vsel %vm1881_vm11, %v1140_v50, -inf  ;;  %vm1882_vm15 = vmmov %vm1881_vm11  ;;  %v839_v44 = vld [vmem:[%s1751_s24 + $0x18] sm:$0xf]  ;;  %v940_v46 = vld [vmem:[%s1842_s5 + $0x10] sm:$0xff] }
  0xf7   : > { %793 = vmax.xlane.f32.xlu2 %v792_v53  ;;  %vm723_vm8 = vcmp.lt.s32.totalorder %v721_v52, %v722_v59  ;;  %v939_v48 = vld [vmem:[%s1842_s5 + $0x8] sm:$0xff]  ;;  %971 = vmatpush.msra.mxu0 %v940_v46  ;;  %v938_v53 = vld [vmem:[%s1842_s5] sm:$0xff]  ;;  %v981_v39 = vld [vmem:[%s1844_s7 + $0x10] sm:$0xff] }
  0xf8   : > { %vm716_vm10 = vcmp.lt.s32.totalorder %v714_v49, %v715_v51  ;;  %v724_v37 = vsel %vm723_vm8, %v721_v52, %v722_v59 }
  0xf9   : > { %v717_v60 = vsel %vm716_vm10, %v714_v49, %v715_v51  ;;  %v725_v61 = vrot.slane %v724_v37, 2  ;;  %972 = vmatpush.msra.mxu0 %v939_v48 }
  0xfa   : > { %vm736_vm4 = vcmp.eq.s32.totalorder %v717_v60, %v1498_v55  ;;  %vm735_vm9 = vcmp.eq.s32.totalorder %v717_v60, %v1487_v43  ;;  %v840_v60 = vld [vmem:[%s1751_s24 + $0x20] sm:$0xff] }
  0xfb   : > { %vm756_vm2 = vmand %vm736_vm4, %vm741_vm1  ;;  %vm726_vm13 = vcmp.lt.s32.totalorder %v724_v37, %v725_v61  ;;  %973 = vmatpush.msra.mxu0 %v938_v53 }
  0xfc   : > { %vm764_vm3 = vmand %vm756_vm2, %vm1574_vm6  ;;  %v727_v58 = vsel %vm726_vm13, %v724_v37, %v725_v61  ;;  %vm742_vm6 = vcmp.lt.s32.totalorder %v1622_v57, %v410_v34  ;;  %v982_v34 = vld [vmem:[%s1844_s7 + $0x18] sm:$0xff] }
  0xfd   : > { %v1142_v21 = vsel %vm764_vm3, 1.0, %v1343_v19  ;;  %vm755_vm0 = vmand %vm735_vm9, %vm741_vm1  ;;  %v728_v0 = vrot.slane %v727_v58, 1  ;;  %vm1886_vm3 = vnez %v1869_v45  ;;  %1002 = vmatpush.msra.mxu1 %v982_v34 }
  0xfe   : > { %v798_v63 = vsel %vm1882_vm15, %v1142_v21, -inf  ;;  %vm763_vm5 = vmand %vm755_vm0, %vm1580_vm7  ;;  %vm1884_vm7 = vnez %v1867_v41 }
  0xff   : > { %799 = vmax.xlane.f32.xlu0 %v798_v63  ;;  %v1141_v47 = vsel %vm763_vm5, 1.0, %v1343_v19  ;;  %vm729_vm11 = vcmp.lt.s32.totalorder %v727_v58, %v728_v0  ;;  %vm1885_vm2 = vmmov %vm1883_vm14  ;;  %vm902_vm5 = vcmask 257024   ;;  %1003 = vmatpush.msra.mxu1 %v981_v39 }
 0x100   : > { %v795_v1 = vsel %vm1883_vm14, %v1141_v47, -inf  ;;  %v730_v31 = vsel %vm729_vm11, %v727_v58, %v728_v0  ;;  %vm1887_vm13 = vmmov %vm1882_vm15  ;;  %vm372_vm15 = vcmask 7168   ;;  %v841_v47 = vld [vmem:[%s1751_s24 + $0x28] sm:$0xf]  ;;  %vm950_vm14 = vcmask 1041409  }
 0x101   : > { %796 = vmax.xlane.f32.xlu2 %v795_v1  ;;  %vm737_vm10 = vcmp.eq.s32.totalorder %v730_v31, %v1487_v43  ;;  %vm738_vm1 = vcmp.eq.s32.totalorder %v730_v31, %v1498_v55  ;;  %373 = vst.msk [vmem:[#allocation2] sm:$0xff] %vm372_vm15, %v1343_v19  ;;  %v808_v43 = vld [vmem:[#allocation2 + $0x8] sm:$0xf]  ;;  %vm952_vm11 = vcmask 1042434  }
 0x102   : > { %vm757_vm8 = vmand %vm737_vm10, %vm742_vm6  ;;  %376 = vst.msk [vmem:[#allocation2 + $0x10] sm:$0xff] %vm372_vm15, %v1343_v19  ;;  %vm1010_vm10 = vcmask 52224  }
 0x103   : > { %vm765_vm4 = vmand %vm757_vm8, %vm1884_vm7  ;;  %378 = vst.msk [vmem:[#allocation2 + $0x20] sm:$0xff] %vm372_vm15, %v1343_v19 }
 0x104   : > { %v1143_v6 = vsel %vm765_vm4, 1.0, %v1343_v19  ;;  %vm758_vm9 = vmand %vm738_vm1, %vm742_vm6  ;;  %380 = vst.msk [vmem:[#allocation2 + $0x30] sm:$0xff] %vm372_vm15, %v1343_v19  ;;  %vm954_vm6 = vcmask 1043459  }
 0x105   : > { %v801_v3 = vsel %vm1885_vm2, %v1143_v6, -inf  ;;  %vm766_vm0 = vmand %vm758_vm9, %vm1886_vm3 }
 0x106   : > { %802 = vmax.xlane.f32.xlu1 %v801_v3  ;;  %v1144_v57 = vsel %vm766_vm0, 1.0, %v1343_v19 }
 0x107   : > { %v804_v4 = vsel %vm1887_vm13, %v1144_v57, -inf }
 0x108   : > { %v807_v41 = vld [vmem:[#allocation2] sm:$0xff] }
 0x109   : > { %805 = vmax.xlane.f32.xlu2 %v804_v4  ;;  %v809_v7 = vld [vmem:[#allocation2 + $0x10] sm:$0xff] }
 0x10a   : > { %v811_v20 = vld [vmem:[#allocation2 + $0x20] sm:$0xff] }
 0x10b   : > { %v813_v24 = vld [vmem:[#allocation2 + $0x30] sm:$0xff] }
 0x15d   : > { %v788_v55 = vpop.xlane.xlu0 %787 }
 0x15e   : > { %v816_v45 = vmax.f32 %v808_v43, %v788_v55 }
 0x160   : > { %v785_v5 = vpop.xlane.xlu2 %784  ;;  %826 = vst.msk [vmem:[#allocation2 + $0x8] sm:$0xf] %vm374_vm12, %v816_v45 }
 0x161   : > { %v815_v32 = vmax.f32 %v807_v41, %v785_v5  ;;  %v842_v41 = vld [vmem:[%s1751_s24 + $0x30] sm:$0xff] }
 0x163   : > { %824 = vst.msk [vmem:[#allocation2] sm:$0xff] %vm372_vm15, %v815_v32 }
 0x167   : > { %v845_v11 = vld [vmem:[#allocation2 + $0x8] sm:$0xf] }
 0x168   : > { %v791_v8 = vpop.xlane.xlu1 %790  ;;  %859 = vperm.xlu1 %1228, %v845_v11  }
 0x169   : > { %v817_v12 = vmax.f32 %v809_v7, %v791_v8 }
 0x16a   : > { %v794_v15 = vpop.xlane.xlu2 %793  ;;  %v844_v16 = vld [vmem:[#allocation2] sm:$0xff] }
 0x16b   : > { %827 = vst.msk [vmem:[#allocation2 + $0x10] sm:$0xff] %vm372_vm15, %v817_v12  ;;  %v818_v54 = vmax.f32 %v810_v9, %v794_v15  ;;  %854 = vperm.xlu0 %1227, %v844_v16   ;;  %v843_v9 = vld [vmem:[%s1751_s24 + $0x38] sm:$0xf]  ;;  %s343_s24 = scalar_lea.vmem [#allocation6], %s1127_s14  ;;  %s1276_s14 = scalar_lea.hbm %s1846_s9, 8 }
 0x16c   : > { %s1025_s26 = sshll.u32 %s343_s24, 4  ;;  %p1278_p2 = scmp.lt.s32.totalorder %s1276_s14, %s1272_s10  ;;  %s1026_s26 = int_to_ptr.vmem [resolvable:$true] %s1025_s26 }
 0x16d   : > { %828 = vst.msk [vmem:[#allocation2 + $0x18] sm:$0xf] %vm374_vm12, %v818_v54 }
 0x16e   : > { %p1279_p3 = por %p1278_p2, %p1277_p1 }
 0x170   : > { %p1280_p5 = pnand %p1279_p3, %p1275_p0 }
 0x172   : > { %v800_v19 = vpop.xlane.xlu0 %799  ;;  %v846_v25 = vld [vmem:[#allocation2 + $0x10] sm:$0xff] }
 0x173   : > { %v820_v23 = vmax.f32 %v812_v17, %v800_v19  ;;  %864 = vperm.xlu2 %1229, %v846_v25  }
 0x174   : > { %v797_v22 = vpop.xlane.xlu2 %796  ;;  %v847_v14 = vld [vmem:[#allocation2 + $0x18] sm:$0xf] }
 0x175   : > { %830 = vst.msk [vmem:[#allocation2 + $0x28] sm:$0xf] %vm374_vm12, %v820_v23  ;;  %v819_v62 = vmax.f32 %v811_v20, %v797_v22  ;;  %869 = vperm.xlu1 %1228, %v847_v14  }
 0x177   : > { %829 = vst.msk [vmem:[#allocation2 + $0x20] sm:$0xff] %vm372_vm15, %v819_v62 }
 0x179   : > { %v803_v26 = vpop.xlane.xlu1 %802 }
 0x17a   : > { %v821_v28 = vmax.f32 %v813_v24, %v803_v26 }
 0x17c   : > { %v849_v2 = vld [vmem:[#allocation2 + $0x28] sm:$0xf]  ;;  %v806_v10 = vpop.xlane.xlu2 %805  ;;  %831 = vst.msk [vmem:[#allocation2 + $0x30] sm:$0xff] %vm372_vm15, %v821_v28 }
 0x17d   : > { %v822_v29 = vmax.f32 %v814_v27, %v806_v10  ;;  %879 = vperm.xlu1 %1228, %v849_v2  }
 0x17e   : > { %v848_v56 = vld [vmem:[#allocation2 + $0x20] sm:$0xff] }
 0x17f   : > { %874 = vperm.xlu2 %1229, %v848_v56   ;;  %832 = vst.msk [vmem:[#allocation2 + $0x38] sm:$0xf] %vm374_vm12, %v822_v29  ;;  %vm900_vm12 = vcmask 261120  }
 0x183   : > { %v850_v30 = vld [vmem:[#allocation2 + $0x30] sm:$0xff] }
 0x186   : > { %v851_v33 = vld [vmem:[#allocation2 + $0x38] sm:$0xf] }
 0x187   : > { %884 = vperm.xlu2 %1229, %v850_v30   ;;  %889 = vperm.xlu0 %1227, %v851_v33  }
 0x1cd   : > { %v865_v36 = vpop.permute.xlu2 %864 }
 0x1ce   : > { %v894_v49 = vmul.f32 %v865_v36, %v838_v13 }
 0x1d0   : > { %v911_v61 = vsel %vm900_vm12, %v894_v49, 0.0  ;;  %v1231_v49 = vld [vmem:[%s1845_s8] ss:$0 sm:$0xff] }
 0x1d9   : > { %v875_v37 = vpop.permute.xlu2 %874 }
 0x1da   : > { %v860_v35 = vpop.permute.xlu1 %859  ;;  %v896_v0 = vmul.f32 %v875_v37, %v840_v60 }
 0x1db   : > { %v893_v50 = vmul.f32 %v860_v35, %v837_v38 }
 0x1dc   : > { %v920_v57 = vsel %vm900_vm12, %v896_v0, 0.0 }
 0x1dd   : > { %v855_v18 = vpop.permute.xlu0 %854  ;;  %v903_v21 = vsel %vm902_vm5, %v893_v50, 0.0 }
 0x1de   : > { %v892_v51 = vmul.f32 %v855_v18, %v836_v40  ;;  %v980_v40 = vld [vmem:[%s1844_s7 + $0x8] sm:$0xff]  ;;  %v979_v18 = vld [vmem:[%s1844_s7] sm:$0xff] }
 0x1df   : > { %1004 = vmatpush.msra.mxu1 %v980_v40 }
 0x1e0   : > { %v901_v63 = vsel %vm900_vm12, %v892_v51, 0.0 }
 0x1e1   : > { %v904_v1 = vadd.f32 %v903_v21, %v901_v63  ;;  %v885_v45 = vpop.permute.xlu2 %884  ;;  %1005 = vmatpush.msra.mxu1 %v979_v18 }
 0x1e2   : > { %v898_v11 = vmul.f32 %v885_v45, %v842_v41 }
 0x1e3   : > { %v905_v43 = vrot.slane %v904_v1, 4 }
 0x1e4   : > { %v929_v19 = vsel %vm900_vm12, %v898_v11, 0.0 }
 0x1e5   : > { %v906_v7 = vadd.f32 %v905_v43, %v904_v1 }
 0x1e7   : > { %v870_v42 = vpop.permute.xlu1 %869  ;;  %v907_v17 = vrot.slane %v906_v7, 2 }
 0x1e8   : > { %v895_v52 = vmul.f32 %v870_v42, %v839_v44  ;;  %v1230_v44 = vld [vmem:[%s1843_s6] ss:$0 sm:$0xff] }
 0x1e9   : > { %v908_v62 = vadd.f32 %v907_v17, %v906_v7 }
 0x1ea   : > { %v912_v59 = vsel %vm902_vm5, %v895_v52, 0.0 }
 0x1eb   : > { %v913_v58 = vadd.f32 %v912_v59, %v911_v61  ;;  %v909_v28 = vrot.slane %v908_v62, 1 }
 0x1ed   : > { %v914_v3 = vrot.slane %v913_v58, 4  ;;  %v910_v30 = vadd.f32 %v909_v28, %v908_v62 }
 0x1ef   : > { %v880_v31 = vpop.permute.xlu1 %879  ;;  %v915_v5 = vadd.f32 %v914_v3, %v913_v58 }
 0x1f0   : > { %v897_v6 = vmul.f32 %v880_v31, %v841_v47 }
 0x1f1   : > { %v916_v12 = vrot.slane %v915_v5, 2 }
 0x1f2   : > { %v921_v4 = vsel %vm902_vm5, %v897_v6, 0.0 }
 0x1f3   : > { %v922_v55 = vadd.f32 %v921_v4, %v920_v57  ;;  %v917_v23 = vadd.f32 %v916_v12, %v915_v5 }
 0x1f5   : > { %v923_v32 = vrot.slane %v922_v55, 4  ;;  %v918_v24 = vrot.slane %v917_v23, 1 }
 0x1f7   : > { %v924_v8 = vadd.f32 %v923_v32, %v922_v55  ;;  %v919_v10 = vadd.f32 %v918_v24, %v917_v23 }
 0x1f9   : > { %v890_v15 = vpop.permute.xlu0 %889  ;;  %v925_v16 = vrot.slane %v924_v8, 2  ;;  %v951_v36 = vsel %vm950_vm14, %v919_v10, %v910_v30 }
 0x1fa   : > { %v899_v54 = vmul.f32 %v890_v15, %v843_v9 }
 0x1fb   : > { %v926_v22 = vadd.f32 %v925_v16, %v924_v8 }
 0x1fc   : > { %v930_v20 = vsel %vm902_vm5, %v899_v54, 0.0 }
 0x1fd   : > { %v931_v25 = vadd.f32 %v930_v20, %v929_v19  ;;  %v927_v27 = vrot.slane %v926_v22, 1 }
 0x1ff   : > { %v932_v14 = vrot.slane %v931_v25, 4  ;;  %v928_v56 = vadd.f32 %v927_v27, %v926_v22 }
 0x201   : > { %v933_v26 = vadd.f32 %v932_v14, %v931_v25  ;;  %v953_v13 = vsel %vm952_vm11, %v928_v56, %v951_v36 }
 0x203   : > { %v934_v2 = vrot.slane %v933_v26, 2 }
 0x205   : > { %v935_v29 = vadd.f32 %v934_v2, %v933_v26 }
 0x207   : > { %v936_v33 = vrot.slane %v935_v29, 1 }
 0x209   : > { %v937_v35 = vadd.f32 %v936_v33, %v935_v29 }
 0x20b   : > { %v955_v38 = vsel %vm954_vm6, %v937_v35, %v953_v13 }
 0x20c   : > { %1145 = vmatmul.msk.f32.vlgmr.msra.gmra.mxu0 %vm900_vm12, %v955_v38 }
 0x289   : > { %v975_v46 = vpop.f32.mrf.mxu0 }
 0x28a   : > { %v976_v48 = vadd.f32 %v1230_v44, %v975_v46 }
 0x28c   : > { %v978_v42 = vmax.f32 %v976_v48, 0.0 }
 0x28e   : > { %1146 = vmatmul.msk.f32.vlgmr.msra.gmra.mxu1 %vm900_vm12, %v978_v42 }
 0x30b   : > { %v1007_v50 = vpop.f32.mrf.mxu1 }
 0x30c   : > { %v1008_v51 = vadd.f32 %v1231_v49, %v1007_v50 }
 0x30e   : > { %1011 = vst.msk [vmem:[%s343_s24] sm:$0xf] %vm1010_vm10, %v1008_v51 }
 0x30f   : > { %1283 = shalt.err (!%p1280_p5)
}
 0x310   : > { %1153 = dma.vmem_to_hbm [thread:$0]  (%p1438_p4), %s1026_s26, 64, %s1028_s11, %s1013_s30  }
 0x311 PF: > { %p1159_p6 = scmp.ge.s32.totalorder %s1336_s20, 2  ;;  %s1039_s13 = sand.u32 1, %s1316_s17  }
 0x312   : > { %s1040_s21 = scalar_lea.sflag [#allocation7], %s1039_s13 }
 0x313   : > { %p1156_p7 = pnand %p1159_p6, %p1445_p8 }
 0x315   : > { %p1157_p9 = pneg %p1156_p7 }
 0x317   : > { %1311 = dma.done.wait (%p1157_p9), %s1040_s21, 64  }
 0x318   : > { %1313 = vsyncadd (%p1157_p9), %s1040_s21, 4294967232  ;;  %s35_s20 = sadd.s32 1, %s1336_s20   ;;  %s1888_s17 = smov %s1320_s18 }
 0x319   : > { %p32_p10 = scmp.ge.s32.totalorder %s35_s20, 4   ;;  %s1889_s18 = smov %s1324_s0 }
 0x31a   : > { %s1890_s0 = smov %s1451_s28  ;;  %s1891_s19 = smov %s1332_s1 }
 0x31b   : > { %s1892_s1 = smov %s1894_s23  ;;  %34 = sbr.rel (!%p32_p10) target bundleno = 11 (0xb), region = 97 }
 0x320   :  { %1046 = vsyncpa [#allocation7], 1 }
 0x321   :  { %1048 = vsyncpa [#allocation7 + $0x1], 1 }

</bundles_post_ra>
